<compile_context>
chip_gen: v6e
topology: v6e:2x2x1
jax: 0.10.0
libtpu: 0.0.40
codegen_flags: <defaults>
</compile_context>

<pallas_src>
import functools

import jax
import jax.numpy as jnp
from jax.experimental import pallas as pl
from jax.experimental.pallas import tpu as pltpu


# Packed input channel layout (C = 9):
#   [flow_y, flow_x, abs_y, abs_x, pc_0, pc_1, pc_2, conf, ones]
C_IN = 9
CONF_ROW = 7
ONES_ROW = 8


# ----------------------------------------------------------------------------
# Pallas kernel: fully fused PCA over a lane-dense tile of packed pixels
# ----------------------------------------------------------------------------
def _pca_kernel(x_ref, w1_ref, w2_ref, out_ref, *, embed_dim):
    """One grid step processes TN pixel columns of the packed [C, N] stream.

      H  = relu(W1T @ X)        block-diag layer 1 for the 3 branches,
                                layer-1 biases fed by the ones channel,
                                row 3E of H is a constant 1 (bias row).
      Y2 = W2T @ H              rows [0:E]  = ff_feat + ap_feat (+2*b2f via
                                              the ones row, BN folded),
                                rows [E:2E] = pc_feat (+bp2f via ones row).
      out = conf * Y2[:E] + Y2[E:]
    """
    x = x_ref[...]                                            # [C, TN] bf16
    conf = x[CONF_ROW:CONF_ROW + 1, :].astype(jnp.float32)    # [1, TN] f32

    h = jnp.dot(w1_ref[...], x, preferred_element_type=jnp.float32)
    h = jnp.maximum(h, 0.0)                                   # [3E+1, TN] f32

    y2 = jnp.dot(w2_ref[...], h, preferred_element_type=jnp.float32)  # [2E, TN]

    out = conf * y2[:embed_dim, :] + y2[embed_dim:, :]        # [E, TN] f32
    out_ref[...] = out.astype(out_ref.dtype)


def _round_up(x, m):
    return ((x + m - 1) // m) * m


def _choose_tile(n_cols, max_tn=8192):
    """Lane-dense tile (multiple of 128).  Single step for tiny inputs,
    otherwise >=2 steps (v7x megacore), capped at max_tn for VMEM budget."""
    if n_cols <= 256:
        return _round_up(max(n_cols, 128), 128)
    return min(max_tn, _round_up(-(-n_cols // 2), 128))


def pca_pallas(x_t, w1t, w2t, embed_dim, out_dtype=jnp.float32):
    """Run the fused PCA kernel on the packed, transposed [C, N] stream."""
    c_in, n = x_t.shape
    k_hidden = w1t.shape[0]            # 3E + 1
    tn = _choose_tile(n)
    grid = -(-n // tn)
    n_pad = grid * tn
    if n_pad != n:
        x_t = jnp.pad(x_t, ((0, 0), (0, n_pad - n)))   # single tiny pad

    kernel = functools.partial(_pca_kernel, embed_dim=embed_dim)

    flops = int(2 * n_pad * (c_in * k_hidden + k_hidden * 2 * embed_dim))
    bytes_acc = int(n_pad * c_in * 2 + n_pad * embed_dim * 4
                    + w1t.size * 2 + w2t.size * 4)

    out = pl.pallas_call(
        kernel,
        out_shape=jax.ShapeDtypeStruct((embed_dim, n_pad), out_dtype),
        grid_spec=pltpu.PrefetchScalarGridSpec(
            num_scalar_prefetch=0,
            grid=(grid,),
            in_specs=[pl.BlockSpec((c_in, tn), lambda i: (0, i)),
                      pl.BlockSpec(w1t.shape, lambda i: (0, 0)),
                      pl.BlockSpec(w2t.shape, lambda i: (0, 0))],
            out_specs=pl.BlockSpec((embed_dim, tn), lambda i: (0, i)),
        ),
        compiler_params=pltpu.CompilerParams(
            dimension_semantics=("parallel",),
            vmem_limit_bytes=32 * 1024 * 1024),
        cost_estimate=pl.CostEstimate(flops=flops, transcendentals=0,
                                      bytes_accessed=bytes_acc),
    )(x_t, w1t, w2t)
    return out[:, :n]


# ----------------------------------------------------------------------------
# Plain-JAX glue: normalization, abs positions, bilinear resize, layout
# ----------------------------------------------------------------------------
def pc_norm(x):
    return (x - x.min()) / (x.max() - x.min() + 1e-8)


def make_abs_pos(h, w):
    """Normalized absolute positions, matching PCA.init_abs_positions.
    Returns [h*w, 2] (row-major over (h, w), channels last: [y, x])."""
    yy = (jnp.arange(h, dtype=jnp.float32) / h - 0.5) * 2.0
    xx = (jnp.arange(w, dtype=jnp.float32) / w - 0.5) * 2.0
    gy = jnp.broadcast_to(yy[:, None], (h, w))
    gx = jnp.broadcast_to(xx[None, :], (h, w))
    return jnp.stack([gy, gx], axis=-1).reshape(h * w, 2)


def interp_matrix(out_size, in_size):
    """Bilinear (align_corners=True) 1-D interpolation matrix [out, in]."""
    if out_size == 1:
        src = jnp.zeros((1,), dtype=jnp.float32)
    else:
        src = (jnp.arange(out_size, dtype=jnp.float32)
               * (in_size - 1) / (out_size - 1))
    i0 = jnp.clip(jnp.floor(src).astype(jnp.int32), 0, in_size - 1)
    i1 = jnp.clip(i0 + 1, 0, in_size - 1)
    frac = src - i0.astype(jnp.float32)
    m = jnp.zeros((out_size, in_size), dtype=jnp.float32)
    rows = jnp.arange(out_size)
    m = m.at[rows, i0].add(1.0 - frac)
    m = m.at[rows, i1].add(frac)
    return m


def bilinear_resize_nchw(x, h_out, w_out):
    """F.interpolate(x, (h_out, w_out), mode='bilinear', align_corners=True)."""
    _, _, h_in, w_in = x.shape
    rh = interp_matrix(h_out, h_in)
    rw = interp_matrix(w_out, w_in)
    return jnp.einsum('hH,bcHW,wW->bchw', rh, x, rw)


# ----------------------------------------------------------------------------
# Parameter construction / offline fusion
# ----------------------------------------------------------------------------
def make_embed_params(key, c_in, embed_dim, eps=1e-5):
    """Deterministic params for Conv1x1 -> ReLU -> BN(eval) -> Conv1x1."""
    ks = jax.random.split(key, 8)
    w1 = 0.1 * jax.random.normal(ks[0], (c_in, embed_dim), jnp.float32)
    b1 = 0.1 * jax.random.normal(ks[1], (1, embed_dim), jnp.float32)
    gamma = 0.5 + jax.random.uniform(ks[2], (1, embed_dim), jnp.float32)
    beta = 0.1 * jax.random.normal(ks[3], (1, embed_dim), jnp.float32)
    rmean = 0.1 * jax.random.normal(ks[4], (1, embed_dim), jnp.float32)
    rvar = 0.5 + jax.random.uniform(ks[5], (1, embed_dim), jnp.float32)
    w2 = 0.1 * jax.random.normal(ks[6], (embed_dim, embed_dim), jnp.float32)
    b2 = 0.1 * jax.random.normal(ks[7], (1, embed_dim), jnp.float32)
    # eval-mode BatchNorm (running stats) as scale/shift
    scale = gamma / jnp.sqrt(rvar + eps)
    shift = beta - rmean * scale
    return (w1, b1, scale, shift, w2, b2)


def pack_params(pos_params, pc_params, embed_dim, w1_dtype=jnp.bfloat16):
    """Fold BN into the second conv, fuse the three branches, fold ALL biases
    into the matmuls (ones input channel / ones hidden row), transposed."""
    w1, b1, s1, t1, w2, b2 = pos_params       # c_in = 2 (flow & abs-pos)
    wp1, bp1, sp1, tp1, wp2, bp2 = pc_params  # c_in = 3 (point cloud)
    E = embed_dim

    # BN fold: y = (relu(.)*s + t) @ W2 + b2 = relu(.) @ (s^T * W2) + (t@W2+b2)
    w2f = w2 * s1.reshape(E, 1)
    b2f = t1 @ w2 + b2
    wp2f = wp2 * sp1.reshape(E, 1)
    bp2f = tp1 @ wp2 + bp2

    K = 3 * E + 1     # hidden rows: [ff(E) | ap(E) | pc(E) | ones(1)]

    # Layer 1 (transposed, block-diagonal), biases via the ones input channel.
    w1t = jnp.zeros((K, C_IN), jnp.float32)
    w1t = w1t.at[0:E, 0:2].set(w1.T)
    w1t = w1t.at[0:E, ONES_ROW].set(b1[0])
    w1t = w1t.at[E:2 * E, 2:4].set(w1.T)
    w1t = w1t.at[E:2 * E, ONES_ROW].set(b1[0])
    w1t = w1t.at[2 * E:3 * E, 4:7].set(wp1.T)
    w1t = w1t.at[2 * E:3 * E, ONES_ROW].set(bp1[0])
    w1t = w1t.at[3 * E, ONES_ROW].set(1.0)     # constant-1 hidden row
    # conf column (CONF_ROW) stays all-zero.

    # Layer 2 (transposed): rows [0:E] -> ff_feat+ap_feat (conf applied later
    # in-kernel), rows [E:2E] -> pc_feat. Biases via the ones hidden row.
    w2t = jnp.zeros((2 * E, K), jnp.float32)
    w2t = w2t.at[0:E, 0:E].set(w2f.T)
    w2t = w2t.at[0:E, E:2 * E].set(w2f.T)
    w2t = w2t.at[0:E, 3 * E].set(2.0 * b2f[0])
    w2t = w2t.at[E:2 * E, 2 * E:3 * E].set(wp2f.T)
    w2t = w2t.at[E:2 * E, 3 * E].set(bp2f[0])

    return (w1t.astype(w1_dtype), w2t.astype(jnp.float32))


# ----------------------------------------------------------------------------
# Full forward: pack all scales into one bf16 [C, N] stream, one pallas_call
# ----------------------------------------------------------------------------
def pca_forward(feat_flow_list, confidence_list, point_cloud,
                packed_params, embed_dim):
    """Inputs:
        feat_flow_list[i]:  [B, h_i, w_i, 2]
        confidence_list[i]: [B, h_i, w_i, 1]
        point_cloud:        [B, 3, H, W]
    Returns list of [B, embed_dim, h_i, w_i]."""
    w1t, w2t = packed_params
    cols, metas = [], []
    for feat_flow, conf in zip(feat_flow_list, confidence_list):
        b, h, w, _ = feat_flow.shape
        n = b * h * w

        ff = jnp.transpose(pc_norm(feat_flow), (3, 0, 1, 2)).reshape(2, n)
        ap_t = make_abs_pos(h, w).T                                   # [2,h*w]
        ap = jnp.broadcast_to(ap_t.reshape(2, 1, h * w),
                              (2, b, h * w)).reshape(2, n)
        pc_rs = pc_norm(bilinear_resize_nchw(point_cloud, h, w))      # [B,3,h,w]
        pcf = jnp.transpose(pc_rs, (1, 0, 2, 3)).reshape(3, n)
        cf = jnp.transpose(conf, (3, 0, 1, 2)).reshape(1, n)
        ones = jnp.ones((1, n), jnp.float32)

        cols.append(jnp.concatenate([ff, ap, pcf, cf, ones],
                                    axis=0).astype(jnp.bfloat16))     # [9, n]
        metas.append((b, h, w, n))

    x_all = jnp.concatenate(cols, axis=1)                             # [9, N]
    out_all = pca_pallas(x_all, w1t, w2t, embed_dim)                  # [E, N]

    outs, off = [], 0
    for (b, h, w, n) in metas:
        o = out_all[:, off:off + n].reshape(embed_dim, b, h, w)
        outs.append(jnp.transpose(o, (1, 0, 2, 3)))                   # NCHW
        off += n
    return outs


# ----------------------------------------------------------------------------
# Pure-JAX (un-fused, f32) reference for a tolerance check
# ----------------------------------------------------------------------------
def _embed_ref(x_flat, params):
    w1, b1, s, t, w2, b2 = params
    h = jnp.maximum(x_flat @ w1 + b1, 0.0)
    h = h * s + t
    return h @ w2 + b2


def pca_reference(feat_flow_list, confidence_list, point_cloud,
                  pos_params, pc_params, embed_dim):
    outs = []
    for feat_flow, conf in zip(feat_flow_list, confidence_list):
        b, h, w, _ = feat_flow.shape
        n = b * h * w
        ff = pc_norm(feat_flow).reshape(n, 2)
        ap = jnp.tile(make_abs_pos(h, w), (b, 1))
        pc_rs = pc_norm(bilinear_resize_nchw(point_cloud, h, w))
        pcf = jnp.transpose(pc_rs, (0, 2, 3, 1)).reshape(n, 3)
        cf = conf.reshape(n, 1)
        out = (cf * (_embed_ref(ff, pos_params) + _embed_ref(ap, pos_params))
               + _embed_ref(pcf, pc_params))
        outs.append(jnp.transpose(out.reshape(b, h, w, embed_dim), (0, 3, 1, 2)))
    return outs


# ----------------------------------------------------------------------------
if __name__ == "__main__":
    key = jax.random.PRNGKey(0)
    k_ff, k_cf, k_pc, k_pos, k_pce = jax.random.split(key, 5)

    # cfg: height=width=32, embed_dim=32, batch=2 ; scales H/4, H/8, H/16
    B, H, W, E = 2, 32, 32, 32
    scales = [2, 3, 4]
    sizes = [(H // 2 ** n, W // 2 ** n) for n in scales]

    ff_keys = jax.random.split(k_ff, len(sizes))
    cf_keys = jax.random.split(k_cf, len(sizes))
    feat_flow_list = [jax.random.normal(kk, (B, h, w, 2), jnp.float32)
                      for kk, (h, w) in zip(ff_keys, sizes)]
    confidence_list = [jax.random.uniform(kk, (B, h, w, 1), jnp.float32)
                       for kk, (h, w) in zip(cf_keys, sizes)]
    point_cloud = jax.random.normal(k_pc, (B, 3, H, W), jnp.float32)

    pos_params = make_embed_params(k_pos, 2, E)   # pos_embed (flow & abs-pos)
    pc_params = make_embed_params(k_pce, 3, E)    # pc_embed
    packed = pack_params(pos_params, pc_params, E)

    fwd = jax.jit(functools.partial(pca_forward,
                                    packed_params=packed, embed_dim=E))
    outs = jax.block_until_ready(fwd(feat_flow_list, confidence_list,
                                     point_cloud))

    expected = [(B, E, h, w) for (h, w) in sizes]
    got = [tuple(o.shape) for o in outs]
    assert got == expected, (got, expected)
    assert all(bool(jnp.isfinite(o).all()) for o in outs)

    # Tolerance check vs un-fused f32 reference (bf16 input stream / layer-1
    # weights in the kernel; everything else f32).
    refs = pca_reference(feat_flow_list, confidence_list, point_cloud,
                         pos_params, pc_params, E)
    for o, r in zip(outs, refs):
        err = float(jnp.max(jnp.abs(o - r)))
        assert err < 5e-2, f"max abs err {err}"

    # TODO(synk): optional even-step grid rounding for v7x 2-TC sharding when
    # the pixel count barely exceeds one tile.
    print("KERNEL_OK")
</pallas_src>

<mosaic_0001>
module attributes {stable_mosaic.version = 11 : i64} {
  func.func private @main(%arg0: i32) attributes {dimension_semantics = [#tpu.dimension_semantics<core_parallel>], iteration_bounds = array<i64: 2>, tpu.core_type = #tpu.core_type<sc_scalar_subcore>, window_params = []} {
    return
  }
}

module attributes {stable_mosaic.version = 11 : i64} {
  func.func private @main(%arg0: i32) attributes {dimension_semantics = [#tpu.dimension_semantics<core_parallel>], iteration_bounds = array<i64: 2>, tpu.core_type = #tpu.core_type<sc_scalar_subcore>, window_params = []} {
    return
  }
}

module attributes {stable_mosaic.version = 11 : i64} {
  func.func @_pca_kernel(%arg0: i32, %arg1: memref<9x256xbf16, #tpu.memory_space<vmem>>, %arg2: memref<97x9xbf16, #tpu.memory_space<vmem>>, %arg3: memref<64x97xf32, #tpu.memory_space<vmem>>, %arg4: memref<32x256xf32, #tpu.memory_space<vmem>>) attributes {dimension_semantics = [#tpu.dimension_semantics<parallel>], iteration_bounds = array<i64: 1>, scalar_prefetch = 0 : i64, scratch_operands = 0 : i64, tpu.core_type = #tpu.core_type<tc>, window_params = [{transform_indices = @transform_0, window_bounds = array<i64: 9, 256>}, {pipeline_mode = #tpu.pipeline_mode<synchronous>, transform_indices = @transform_1, window_bounds = array<i64: 97, 9>}, {pipeline_mode = #tpu.pipeline_mode<synchronous>, transform_indices = @transform_2, window_bounds = array<i64: 64, 97>}, {transform_indices = @transform_3, window_bounds = array<i64: 32, 256>}]} {
    %c0 = arith.constant 0 : index
    %c0_0 = arith.constant 0 : index
    %0 = vector.load %arg1[%c0, %c0_0] : memref<9x256xbf16, #tpu.memory_space<vmem>>, vector<9x256xbf16>
    %1 = vector.extract_strided_slice %0 {offsets = [7, 0], sizes = [1, 256], strides = [1, 1]} : vector<9x256xbf16> to vector<1x256xbf16>
    %2 = arith.extf %1 : vector<1x256xbf16> to vector<1x256xf32>
    %c0_1 = arith.constant 0 : index
    %c0_2 = arith.constant 0 : index
    %3 = vector.load %arg2[%c0_1, %c0_2] : memref<97x9xbf16, #tpu.memory_space<vmem>>, vector<97x9xbf16>
    %cst = arith.constant dense<0.000000e+00> : vector<97x256xf32>
    %4 = tpu.matmul %3, %0, %cst {dimension_numbers = #tpu.dot_dimension_numbers<[1], [0], [0], [1], [0, 0, 1, 1], [], []>} : vector<97x9xbf16>, vector<9x256xbf16>, vector<97x256xf32> -> vector<97x256xf32>
    %cst_3 = arith.constant 0.000000e+00 : f32
    %5 = vector.broadcast %cst_3 : f32 to vector<97x256xf32>
    %6 = arith.maximumf %4, %5 : vector<97x256xf32>
    %c0_4 = arith.constant 0 : index
    %c0_5 = arith.constant 0 : index
    %7 = vector.load %arg3[%c0_4, %c0_5] : memref<64x97xf32, #tpu.memory_space<vmem>>, vector<64x97xf32>
    %cst_6 = arith.constant dense<0.000000e+00> : vector<64x256xf32>
    %8 = tpu.matmul %7, %6, %cst_6 {dimension_numbers = #tpu.dot_dimension_numbers<[1], [0], [0], [1], [0, 0, 1, 1], [], []>} : vector<64x97xf32>, vector<97x256xf32>, vector<64x256xf32> -> vector<64x256xf32>
    %9 = vector.extract_strided_slice %8 {offsets = [0, 0], sizes = [32, 256], strides = [1, 1]} : vector<64x256xf32> to vector<32x256xf32>
    %10 = vector.broadcast %2 : vector<1x256xf32> to vector<32x256xf32>
    %11 = arith.mulf %10, %9 : vector<32x256xf32>
    %12 = vector.extract_strided_slice %8 {offsets = [32, 0], sizes = [32, 256], strides = [1, 1]} : vector<64x256xf32> to vector<32x256xf32>
    %13 = arith.addf %11, %12 : vector<32x256xf32>
    %c0_7 = arith.constant 0 : index
    %c0_8 = arith.constant 0 : index
    %14 = vector.load %arg4[%c0_7, %c0_8] : memref<32x256xf32, #tpu.memory_space<vmem>>, vector<32x256xf32>
    tpu.vector_store %arg4[%c0_7, %c0_8], %13 {strides = array<i32>} : memref<32x256xf32, #tpu.memory_space<vmem>>, vector<32x256xf32>,
    return
  }
  func.func @transform_0(%arg0: i32) -> (i32, i32) {
    %c0_i32 = arith.constant 0 : i32
    %c0_i32_0 = arith.constant 0 : i32
    return %c0_i32, %arg0 : i32, i32
  }
  func.func @transform_1(%arg0: i32) -> (i32, i32) {
    %c0_i32 = arith.constant 0 : i32
    %c0_i32_0 = arith.constant 0 : i32
    %c0_i32_1 = arith.constant 0 : i32
    return %c0_i32, %c0_i32_0 : i32, i32
  }
  func.func @transform_2(%arg0: i32) -> (i32, i32) {
    %c0_i32 = arith.constant 0 : i32
    %c0_i32_0 = arith.constant 0 : i32
    %c0_i32_1 = arith.constant 0 : i32
    return %c0_i32, %c0_i32_0 : i32, i32
  }
  func.func @transform_3(%arg0: i32) -> (i32, i32) {
    %c0_i32 = arith.constant 0 : i32
    %c0_i32_0 = arith.constant 0 : i32
    return %c0_i32, %arg0 : i32, i32
  }
}

</mosaic_0001>

<bundles_post_ra>
// kernel: pca_forward.1
= control target key start
LH: loop header
LB: loop body
LE: loop exit
PB: predicated region body
PF: predicated region fallthrough
CT: control target
= control target key end

     0   :  { %vm95_vm0 = vcmask 1043456   ;;  %vm96_vm1 = vcmask 1044480   ;;  %v459_v2 = vmov 65535   ;;  %v460_v4 = vmov 0   ;;  %s607_s0 = inlined_call_operand.vmem [shape: bf16[9,256], index: 0, kind: input, shape index: {}]   ;;  %s608_s1 = inlined_call_operand.vmem [shape: bf16[97,9], index: 1, kind: input, shape index: {}]   ;;  %s609_s2 = inlined_call_operand.vmem [shape: f32[64,97], index: 2, kind: input, shape index: {}]   ;;  %s610_s3 = inlined_call_operand.vmem [shape: f32[32,256], index: 3, kind: output, shape index: {}]  }
   0x1   :  { %v485_v0 = vld [vmem:[%s607_s0] sm:$0xff]  ;;  %v16_v1 = vld [vmem:[%s607_s0 + $0x8] sm:$0x11]  ;;  %v97_v3 = vsel %vm95_vm0, 4294967295, %v459_v2  ;;  %137 = vmatprep.mubr.bf16.mxu0 %v460_v4  ;;  %vm73_vm2 = vcmask 72704   ;;  %v454_v12 = vld [vmem:[%s608_s1 + $0x10] sm:$0xff]  }
   0x2   :  { %v429_v5 = vcombine.high %v485_v0, %v16_v1  ;;  %v98_v6 = vsel %vm96_vm1, %v97_v3, 0  ;;  %v428_v7 = vcombine.low %v485_v0, %v16_v1  ;;  %v452_v10 = vld [vmem:[%s608_s1] sm:$0xff]   ;;  %v453_v11 = vld [vmem:[%s608_s1 + $0x8] sm:$0xff]   ;;  %v455_v13 = vld [vmem:[%s608_s1 + $0x18] sm:$0xff]   ;;  %v461_v17 = vmov 0.0  }
   0x3   :  { %v456_v14 = vld [vmem:[%s608_s1 + $0x20] sm:$0xff]   ;;  %v457_v15 = vld [vmem:[%s608_s1 + $0x28] sm:$0xff]   ;;  %v458_v16 = vld [vmem:[%s608_s1 + $0x30] ss:$0 sps:$4 sm:$0x11]   ;;  %336 = vmatprep.mubr.f32.mxu1 %v461_v17  ;;  %vm265_vm3 = vcmask 1040384  }
   0x4   :  { %v103_v8 = vand.u32 %v429_v5, %v98_v6  ;;  %v100_v9 = vand.u32 %v428_v7, %v98_v6  ;;  %vm240_vm4 = vcmask 793600  }
   0x6   :  { %119 = vmatprep.subr.bf16.mxu0 %v103_v8 }
   0x7   :  { %120 = vmatpush1.bf16.msra.mxu0 %v100_v9  ;;  %v232_v9 = vld [vmem:[%s609_s2] sm:$0xff] }
   0xa   :  { %430 = vmatmul.mubr.msk.bf16.vlgmr.msra.gmra.mxu0 %vm73_vm2, %v452_v10  ;;  %v233_v10 = vld [vmem:[%s609_s2 + $0x8] sm:$0xff] }
   0xb   :  { %147 = vmatprep.mubr.bf16.mxu0 %v460_v4 }
  0x12   :  { %431 = vmatmul.mubr.msk.bf16.gmra.mxu0 %vm73_vm2, %v453_v11  ;;  %v234_v11 = vld [vmem:[%s609_s2 + $0x10] sm:$0xff] }
  0x13   :  { %157 = vmatprep.mubr.bf16.mxu0 %v460_v4 }
  0x1a   :  { %432 = vmatmul.mubr.msk.bf16.gmra.mxu0 %vm73_vm2, %v454_v12  ;;  %v235_v12 = vld [vmem:[%s609_s2 + $0x18] sm:$0xff] }
  0x1b   :  { %167 = vmatprep.mubr.bf16.mxu0 %v460_v4 }
  0x22   :  { %433 = vmatmul.mubr.msk.bf16.gmra.mxu0 %vm73_vm2, %v455_v13  ;;  %v236_v13 = vld [vmem:[%s609_s2 + $0x20] sm:$0xff] }
  0x23   :  { %177 = vmatprep.mubr.bf16.mxu0 %v460_v4 }
  0x2a   :  { %434 = vmatmul.mubr.msk.bf16.gmra.mxu0 %vm73_vm2, %v456_v14  ;;  %v237_v14 = vld [vmem:[%s609_s2 + $0x28] sm:$0xff] }
  0x2b   :  { %187 = vmatprep.mubr.bf16.mxu0 %v460_v4 }
  0x32   :  { %435 = vmatmul.mubr.msk.bf16.gmra.mxu0 %vm73_vm2, %v457_v15  ;;  %v238_v15 = vld [vmem:[%s609_s2 + $0x30] sm:$0xff] }
  0x33   :  { %197 = vmatprep.mubr.bf16.mxu0 %v460_v4 }
  0x3a   :  { %436 = vmatmul.mubr.msk.bf16.gmra.mxu0 %vm73_vm2, %v458_v16  ;;  %v239_v16 = vld [vmem:[%s609_s2 + $0x38] sm:$0xff] }
  0xca   :  { %v521_v18 = vpop.f32.mrf.mxu0 }
  0xcb   :  { %v206_v8 = vmax.f32 %v521_v18, 0.0  ;;  %v385_v18 = vlaneseq }
  0xcc   :  { %v523_v19 = vpop.f32.mrf.mxu0 }
  0xcd   :  { %v207_v7 = vmax.f32 %v523_v19, 0.0 }
  0xce   :  { %v525_v20 = vpop.f32.mrf.mxu0 }
  0xcf   :  { %v208_v6 = vmax.f32 %v525_v20, 0.0 }
  0xd0   :  { %v527_v21 = vpop.f32.mrf.mxu0 }
  0xd1   :  { %v209_v5 = vmax.f32 %v527_v21, 0.0  ;;  %v386_v21 = vshrl.u32 %v385_v18, 7 }
  0xd2   :  { %v529_v22 = vpop.f32.mrf.mxu0 }
  0xd3   :  { %v210_v4 = vmax.f32 %v529_v22, 0.0 }
  0xd4   :  { %v531_v23 = vpop.f32.mrf.mxu0 }
  0xd5   :  { %v211_v3 = vmax.f32 %v531_v23, 0.0 }
  0xd6   :  { %v533_v24 = vpop.f32.mrf.mxu0 }
  0xd7   :  { %v212_v2 = vmax.f32 %v533_v24, 0.0  ;;  %v17_v24 = vunpack.c.l.bf16 %v485_v0 }
  0xd8   :  { %v155_v25 = vpop.f32.mrf.mxu0 }
  0xd9   :  { %v213_v1 = vmax.f32 %v155_v25, 0.0  ;;  %v387_v25 = vsub.s32 7, %v386_v21 }
  0xda   :  { %v159_v26 = vpop.f32.mrf.mxu0 }
  0xdb   :  { %v214_v63 = vmax.f32 %v159_v26, 0.0 }
  0xdc   :  { %v161_v27 = vpop.f32.mrf.mxu0 }
  0xdd   :  { %v215_v62 = vmax.f32 %v161_v27, 0.0  ;;  %v18_v27 = vunpack.c.h.bf16 %v485_v0 }
  0xde   :  { %v163_v28 = vpop.f32.mrf.mxu0 }
  0xdf   :  { %v216_v61 = vmax.f32 %v163_v28, 0.0 }
  0xe0   :  { %v165_v29 = vpop.f32.mrf.mxu0 }
  0xe1   :  { %v217_v60 = vmax.f32 %v165_v29, 0.0 }
  0xe2   :  { %v169_v30 = vpop.f32.mrf.mxu0 }
  0xe3   :  { %v218_v59 = vmax.f32 %v169_v30, 0.0  ;;  %v392_v30 = vrot.slane %v18_v27, %v387_v25 }
  0xe4   :  { %v171_v31 = vpop.f32.mrf.mxu0 }
  0xe5   :  { %v219_v58 = vmax.f32 %v171_v31, 0.0 }
  0xe6   :  { %v173_v32 = vpop.f32.mrf.mxu0 }
  0xe7   :  { %v220_v57 = vmax.f32 %v173_v32, 0.0 }
  0xe8   :  { %v175_v33 = vpop.f32.mrf.mxu0 }
  0xe9   :  { %v221_v56 = vmax.f32 %v175_v33, 0.0 }
  0xea   :  { %v179_v34 = vpop.f32.mrf.mxu0 }
  0xeb   :  { %v222_v55 = vmax.f32 %v179_v34, 0.0 }
  0xec   :  { %v181_v35 = vpop.f32.mrf.mxu0 }
  0xed   :  { %v223_v54 = vmax.f32 %v181_v35, 0.0 }
  0xee   :  { %v183_v36 = vpop.f32.mrf.mxu0 }
  0xef   :  { %v224_v53 = vmax.f32 %v183_v36, 0.0 }
  0xf0   :  { %v185_v37 = vpop.f32.mrf.mxu0 }
  0xf1   :  { %v225_v52 = vmax.f32 %v185_v37, 0.0 }
  0xf2   :  { %v189_v38 = vpop.f32.mrf.mxu0 }
  0xf3   :  { %v226_v51 = vmax.f32 %v189_v38, 0.0 }
  0xf4   :  { %v191_v39 = vpop.f32.mrf.mxu0 }
  0xf5   :  { %v227_v50 = vmax.f32 %v191_v39, 0.0 }
  0xf6   :  { %v193_v40 = vpop.f32.mrf.mxu0 }
  0xf7   :  { %v228_v48 = vmax.f32 %v193_v40, 0.0 }
  0xf8   :  { %v195_v41 = vpop.f32.mrf.mxu0 }
  0xf9   :  { %v229_v47 = vmax.f32 %v195_v41, 0.0 }
  0xfa   :  { %v199_v42 = vpop.f32.mrf.mxu0 }
  0xfb   :  { %v230_v45 = vmax.f32 %v199_v42, 0.0 }
  0xfc   :  { %v201_v43 = vpop.f32.mrf.mxu0 }
  0xfd   :  { %v231_v44 = vmax.f32 %v201_v43, 0.0 }
  0xfe   :  { %v203_v46 = vpop.f32.mrf.mxu0 }
  0xff   :  { %437 = vmatprep.subr.msk.mxu1 %vm265_vm3, %v231_v44 }
 0x100   :  { %v204_v49 = vpop.f32.mrf.mxu0  ;;  %438 = vmatpush1.msk.msra.mxu1 %vm265_vm3, %v230_v45 }
 0x101   :  { %280 = vmatprep.subr.mxu1 %v229_v47 }
 0x102   :  { %281 = vmatpush1.msra.mxu1 %v228_v48 }
 0x103   :  { %282 = vmatprep.subr.mxu1 %v227_v50 }
 0x104   :  { %283 = vmatpush1.msra.mxu1 %v226_v51 }
 0x105   :  { %284 = vmatprep.subr.mxu1 %v225_v52 }
 0x106   :  { %285 = vmatpush1.msra.mxu1 %v224_v53 }
 0x107   :  { %286 = vmatprep.subr.mxu1 %v223_v54 }
 0x108   :  { %287 = vmatpush1.msra.mxu1 %v222_v55 }
 0x109   :  { %288 = vmatprep.subr.mxu1 %v221_v56 }
 0x10a   :  { %289 = vmatpush1.msra.mxu1 %v220_v57 }
 0x10b   :  { %290 = vmatprep.subr.mxu1 %v219_v58 }
 0x10c   :  { %291 = vmatpush1.msra.mxu1 %v218_v59 }
 0x10d   :  { %292 = vmatprep.subr.mxu1 %v217_v60 }
 0x10e   :  { %293 = vmatpush1.msra.mxu1 %v216_v61 }
 0x10f   :  { %294 = vmatprep.subr.mxu1 %v215_v62 }
 0x110   :  { %295 = vmatpush1.msra.mxu1 %v214_v63 }
 0x111   :  { %296 = vmatprep.subr.mxu1 %v213_v1 }
 0x112   :  { %297 = vmatpush1.msra.mxu1 %v212_v2 }
 0x113   :  { %298 = vmatprep.subr.mxu1 %v211_v3 }
 0x114   :  { %299 = vmatpush1.msra.mxu1 %v210_v4 }
 0x115   :  { %300 = vmatprep.subr.mxu1 %v209_v5 }
 0x116   :  { %301 = vmatpush1.msra.mxu1 %v208_v6 }
 0x117   :  { %302 = vmatprep.subr.mxu1 %v207_v7 }
 0x118   :  { %303 = vmatpush1.msra.mxu1 %v206_v8 }
 0x119   :  { %439 = vmatmul.mubr.msk.f32.vlgmr.msra.gmra.mxu1 %vm240_vm4, %v232_v9 }
 0x11a   :  { %342 = vmatprep.mubr.f32.mxu1 %v461_v17 }
 0x11d   :  { %440 = vmatmul.mubr.msk.f32.gmra.mxu1 %vm240_vm4, %v233_v10 }
 0x11e   :  { %348 = vmatprep.mubr.f32.mxu1 %v461_v17 }
 0x121   :  { %441 = vmatmul.mubr.msk.f32.gmra.mxu1 %vm240_vm4, %v234_v11 }
 0x122   :  { %354 = vmatprep.mubr.f32.mxu1 %v461_v17 }
 0x125   :  { %442 = vmatmul.mubr.msk.f32.gmra.mxu1 %vm240_vm4, %v235_v12 }
 0x126   :  { %360 = vmatprep.mubr.f32.mxu1 %v461_v17 }
 0x129   :  { %443 = vmatmul.mubr.msk.f32.gmra.mxu1 %vm240_vm4, %v236_v13 }
 0x12a   :  { %366 = vmatprep.mubr.f32.mxu1 %v461_v17 }
 0x12d   :  { %444 = vmatmul.mubr.msk.f32.gmra.mxu1 %vm240_vm4, %v237_v14 }
 0x12e   :  { %372 = vmatprep.mubr.f32.mxu1 %v461_v17 }
 0x131   :  { %445 = vmatmul.mubr.msk.f32.gmra.mxu1 %vm240_vm4, %v238_v15 }
 0x132   :  { %378 = vmatprep.mubr.f32.mxu1 %v461_v17  ;;  %v388_v17 = vrot.slane %v17_v24, %v387_v25 }
 0x135   :  { %446 = vmatmul.mubr.msk.f32.gmra.mxu1 %vm240_vm4, %v239_v16 }
 0x1d9   :  { %v338_v19 = vpop.f32.mrf.mxu1 }
 0x1da   :  { %v393_v32 = vmul.f32 %v388_v17, %v338_v19 }
 0x1db   :  { %v340_v20 = vpop.f32.mrf.mxu1 }
 0x1dc   :  { %v394_v34 = vmul.f32 %v392_v30, %v340_v20 }
 0x1dd   :  { %v344_v22 = vpop.f32.mrf.mxu1 }
 0x1de   :  { %v395_v37 = vmul.f32 %v388_v17, %v344_v22 }
 0x1df   :  { %v346_v23 = vpop.f32.mrf.mxu1 }
 0x1e0   :  { %v396_v40 = vmul.f32 %v392_v30, %v346_v23 }
 0x1e1   :  { %v350_v26 = vpop.f32.mrf.mxu1 }
 0x1e2   :  { %v397_v42 = vmul.f32 %v388_v17, %v350_v26 }
 0x1e3   :  { %v352_v28 = vpop.f32.mrf.mxu1 }
 0x1e4   :  { %v398_v45 = vmul.f32 %v392_v30, %v352_v28 }
 0x1e5   :  { %v356_v29 = vpop.f32.mrf.mxu1 }
 0x1e6   :  { %v399_v48 = vmul.f32 %v388_v17, %v356_v29 }
 0x1e7   :  { %v358_v31 = vpop.f32.mrf.mxu1 }
 0x1e8   :  { %v400_v51 = vmul.f32 %v392_v30, %v358_v31 }
 0x1e9   :  { %v362_v33 = vpop.f32.mrf.mxu1 }
 0x1ea   :  { %v401_v35 = vadd.f32 %v393_v32, %v362_v33 }
 0x1eb   :  { %v364_v36 = vpop.f32.mrf.mxu1 }
 0x1ec   :  { %409 = vst [vmem:[%s610_s3] sm:$0xff] %v401_v35  ;;  %v402_v38 = vadd.f32 %v394_v34, %v364_v36 }
 0x1ed   :  { %v368_v39 = vpop.f32.mrf.mxu1 }
 0x1ee   :  { %410 = vst [vmem:[%s610_s3 + $0x8] sm:$0xff] %v402_v38  ;;  %v403_v0 = vadd.f32 %v395_v37, %v368_v39 }
 0x1ef   :  { %v370_v41 = vpop.f32.mrf.mxu1 }
 0x1f0   :  { %411 = vst [vmem:[%s610_s3 + $0x10] sm:$0xff] %v403_v0  ;;  %v404_v43 = vadd.f32 %v396_v40, %v370_v41 }
 0x1f1   :  { %v374_v44 = vpop.f32.mrf.mxu1 }
 0x1f2   :  { %412 = vst [vmem:[%s610_s3 + $0x18] sm:$0xff] %v404_v43  ;;  %v405_v46 = vadd.f32 %v397_v42, %v374_v44 }
 0x1f3   :  { %v376_v47 = vpop.f32.mrf.mxu1 }
 0x1f4   :  { %413 = vst [vmem:[%s610_s3 + $0x20] sm:$0xff] %v405_v46  ;;  %v406_v49 = vadd.f32 %v398_v45, %v376_v47 }
 0x1f5   :  { %v380_v50 = vpop.f32.mrf.mxu1 }
 0x1f6   :  { %414 = vst [vmem:[%s610_s3 + $0x28] sm:$0xff] %v406_v49  ;;  %v407_v52 = vadd.f32 %v399_v48, %v380_v50 }
 0x1f7   :  { %v382_v53 = vpop.f32.mrf.mxu1 }
 0x1f8   :  { %415 = vst [vmem:[%s610_s3 + $0x30] sm:$0xff] %v407_v52  ;;  %v408_v54 = vadd.f32 %v400_v51, %v382_v53 }
 0x1fa   :  { %416 = vst [vmem:[%s610_s3 + $0x38] sm:$0xff] %v408_v54 }

</bundles_post_ra>
